<compile_context>
chip_gen: v7x
topology: tpu7x:2x2x1
jax: 0.10.0
libtpu: 0.0.40
codegen_flags: <defaults>
</compile_context>

<pallas_src>
import numpy as np

import jax
import jax.numpy as jnp
from jax.experimental import pallas as pl
from jax.experimental.pallas import tpu as pltpu

_LANE = 128


def _vmem_capacity_bytes():
    """Physical VMEM per core; conservative 64 MiB (v7x) fallback if unqueryable."""
    try:
        info = pltpu.get_tpu_info()
        cap = getattr(info, "vmem_capacity_bytes", None)
        if cap:
            return int(cap)
    except Exception:
        pass
    return 64 * 1024 * 1024


def _group_taps(k_np):
    """Group (i, j) tap offsets by identical coefficient (symmetric filters collapse)."""
    kh, kw = k_np.shape
    groups = {}
    for i in range(kh):
        for j in range(kw):
            groups.setdefault(float(np.float32(k_np[i, j])), []).append((i, j))
    return list(groups.items())


def _make_kernel(kh, kw, rows_out, Wo, tap_groups):
    """Build the per-band kernel.  tap_groups is None => SMEM tap-table fallback."""
    baked = tap_groups is not None

    def body(x_ref, o_ref, w_ref=None):
        # x_ref: (rows_out + kh - 1, W, Pblk)  lane-dense input band (incl. row halo)
        # o_ref: (rows_out, Wo, Pblk)          lane-dense VALID-conv output band
        xf = x_ref[...]
        if xf.dtype != jnp.float32:
            # Hoisted upcast: one pass over the band instead of one pass per tap.
            xf = xf.astype(jnp.float32)
        # Hoist the kw sublane (W-axis) shifted slabs; each is reused by all kh row taps,
        # so the sublane-misaligned slicing happens kw times, not kh*kw times.
        # (A pltpu.roll-on-XLU variant could also free the vector-load slot on v7x; the
        #  wraparound would land outside the consumed [0:Wo) window.)
        shifted = [xf[:, j:j + Wo, :] for j in range(kw)]

        if baked:
            acc = None
            for val, offsets in tap_groups:
                grp = None
                for (i, j) in offsets:
                    s = shifted[j][i:i + rows_out, :, :]
                    grp = s if grp is None else grp + s
                term = grp if val == 1.0 else grp * val
                acc = term if acc is None else acc + term
        else:
            taps = [w_ref[k] for k in range(kh * kw)]  # hoisted SMEM scalar reads
            acc = None
            for i in range(kh):
                for j in range(kw):
                    term = shifted[j][i:i + rows_out, :, :] * taps[i * kw + j]
                    acc = term if acc is None else acc + term

        o_ref[...] = acc.astype(o_ref.dtype)

    if baked:
        def kernel(x_ref, o_ref):
            body(x_ref, o_ref)
    else:
        def kernel(x_ref, w_ref, o_ref):
            body(x_ref, o_ref, w_ref)
    return kernel


def image_filter(x, kernel2d):
    """Depthwise 'VALID' conv of NCHW `x`, the same 2D `kernel2d` applied per channel.

    Equivalent to ImageFilter.forward == F.conv2d(x, weight, groups=C) with
    weight[c, 0] == kernel2d for every channel c.
    """
    B, C, H, W = x.shape
    kh, kw = kernel2d.shape
    Ho, Wo = H - kh + 1, W - kw + 1
    itemsize = x.dtype.itemsize

    # Bake taps as Python constants when kernel2d is concrete (the ImageFilter case);
    # otherwise fall back to a 1-D SMEM tap table.
    try:
        k_np = np.asarray(kernel2d, dtype=np.float32)
        tap_groups = _group_taps(k_np)
        w_smem = None
    except Exception:  # traced filter values
        tap_groups = None
        w_smem = jnp.asarray(kernel2d, jnp.float32).reshape(kh * kw)

    # ---- layout plumbing: fold B*C onto the 128-lane axis (lane-dense I/O) ----
    # These transposes are separate HBM passes; for a purely HBM-bound v5e deployment a
    # planes-last layout end-to-end (and bf16 storage) would remove/halve that traffic.
    P = B * C
    Ppad = ((P + _LANE - 1) // _LANE) * _LANE
    xt = jnp.transpose(x, (2, 3, 0, 1)).reshape(H, W, P)
    if Ppad != P:
        xt = jnp.pad(xt, ((0, 0), (0, 0), (0, Ppad - P)))

    # ---- VMEM-aware tile selection ----
    cap = _vmem_capacity_bytes()
    budget = int(0.75 * cap)

    def footprint(rows_in, rows_out, pblk):
        # Double-buffered input+output blocks (BlockSpec keeps two of each in flight)...
        io = (rows_in * W + rows_out * Wo) * pblk * itemsize
        # ...plus f32 working slabs: upcast copy + kw shifted slabs + accumulator.
        work = (rows_in * W + kw * rows_in * Wo + rows_out * Wo) * pblk * 4
        return int(2.2 * io) + work

    cands = [c for c in (1024, 512, 256, 128) if Ppad % c == 0]
    # Prefer >= 2 grid steps (feeds v7x's second TensorCore and lets the double buffer
    # overlap DMA with compute); fall back to a single fat step only when unavoidable.
    ordered = [c for c in cands if Ppad // c >= 2] + [c for c in cands if Ppad // c < 2]
    Pblk = None
    for c in ordered:
        if footprint(H, Ho, c) <= budget:
            Pblk = c
            break
    if Pblk is None:
        Pblk = min(cands)  # smallest lane block; rely on row banding below

    # Row banding with a (kh-1)-row input halo keeps blocks inside VMEM for large images
    # (binds first on v7x's 64 MiB). Small images take a single band.
    Rb = Ho
    while Rb > 8 and footprint(Rb + kh - 1, Rb, Pblk) > budget:
        Rb = max(8, (Rb + 1) // 2)

    vmem_limit = int(min(int(0.85 * cap),
                         max(32 * 1024 * 1024,
                             footprint(Rb + kh - 1, Rb, Pblk) + (8 << 20))))

    compiler_params = pltpu.CompilerParams(
        dimension_semantics=("parallel",),
        vmem_limit_bytes=vmem_limit,
    )

    def run_band(x_band, rows_out):
        rows_in = rows_out + kh - 1
        kern = _make_kernel(kh, kw, rows_out, Wo, tap_groups)
        in_specs = [pl.BlockSpec((rows_in, W, Pblk), lambda p: (0, 0, p))]
        args = [x_band]
        if w_smem is not None:
            in_specs.append(pl.BlockSpec(memory_space=pltpu.MemorySpace.SMEM))
            args.append(w_smem)
        return pl.pallas_call(
            kern,
            out_shape=jax.ShapeDtypeStruct((rows_out, Wo, Ppad), x.dtype),
            grid_spec=pltpu.PrefetchScalarGridSpec(
                num_scalar_prefetch=0,
                grid=(Ppad // Pblk,),
                in_specs=in_specs,
                out_specs=pl.BlockSpec((rows_out, Wo, Pblk), lambda p: (0, 0, p)),
            ),
            compiler_params=compiler_params,
        )(*args)

    bands = []
    r0 = 0
    while r0 < Ho:
        rows_out = min(Rb, Ho - r0)
        bands.append(run_band(xt[r0:r0 + rows_out + kh - 1], rows_out))
        r0 += rows_out
    out_t = bands[0] if len(bands) == 1 else jnp.concatenate(bands, axis=0)

    # Undo the layout plumbing: (Ho, Wo, B*C) -> (B, C, Ho, Wo).
    out = out_t[:, :, :P].reshape(Ho, Wo, B, C)
    return jnp.transpose(out, (2, 3, 0, 1))


def _reference(x, kernel2d):
    """Plain-JAX reference matching torch.nn.functional.conv2d(groups=C)."""
    C = x.shape[1]
    kh, kw = kernel2d.shape
    w = jnp.broadcast_to(jnp.asarray(kernel2d, jnp.float32)[None, None], (C, 1, kh, kw))
    return jax.lax.conv_general_dilated(
        x, w, window_strides=(1, 1), padding="VALID",
        dimension_numbers=("NCHW", "OIHW", "NCHW"),
        feature_group_count=C,
    )


if __name__ == "__main__":
    key = jax.random.PRNGKey(0)

    # Small NCHW batch consistent with the module's forward.
    B, C, H, W = 2, 4, 16, 16
    x = jax.random.normal(key, (B, C, H, W), dtype=jnp.float32)

    # Deterministic 3x3 Gaussian blur filter (typical ImageFilter use case), as a
    # concrete numpy array — matches the nn.Module's `kernel` ndarray argument and
    # exercises the baked-constant tap path.
    g1d = np.array([1.0, 2.0, 1.0], np.float32)
    kernel2d = np.outer(g1d, g1d)
    kernel2d = (kernel2d / kernel2d.sum()).astype(np.float32)

    out = jax.block_until_ready(image_filter(x, kernel2d))
    ref = jax.block_until_ready(_reference(x, kernel2d))

    assert out.shape == (B, C, H - 2, W - 2), out.shape
    assert jnp.allclose(out, ref, atol=1e-5, rtol=1e-5), "mismatch vs reference depthwise conv"

    print("KERNEL_OK")
</pallas_src>

<mosaic_0001>
module attributes {stable_mosaic.version = 11 : i64} {
  func.func @kernel(%arg0: i32, %arg1: memref<16x16x128xf32, #tpu.memory_space<vmem>>, %arg2: memref<14x14x128xf32, #tpu.memory_space<vmem>>) attributes {dimension_semantics = [#tpu.dimension_semantics<parallel>], iteration_bounds = array<i64: 1>, scalar_prefetch = 0 : i64, scratch_operands = 0 : i64, tpu.core_type = #tpu.core_type<tc>, window_params = [{transform_indices = @transform_0, window_bounds = array<i64: 16, 16, 128>}, {transform_indices = @transform_1, window_bounds = array<i64: 14, 14, 128>}]} {
    %c0 = arith.constant 0 : index
    %c0_0 = arith.constant 0 : index
    %c0_1 = arith.constant 0 : index
    %0 = vector.load %arg1[%c0, %c0_0, %c0_1] : memref<16x16x128xf32, #tpu.memory_space<vmem>>, vector<16x16x128xf32>
    %1 = vector.extract_strided_slice %0 {offsets = [0, 0, 0], sizes = [16, 14, 128], strides = [1, 1, 1]} : vector<16x16x128xf32> to vector<16x14x128xf32>
    %2 = vector.extract_strided_slice %0 {offsets = [0, 1, 0], sizes = [16, 14, 128], strides = [1, 1, 1]} : vector<16x16x128xf32> to vector<16x14x128xf32>
    %3 = vector.extract_strided_slice %0 {offsets = [0, 2, 0], sizes = [16, 14, 128], strides = [1, 1, 1]} : vector<16x16x128xf32> to vector<16x14x128xf32>
    %4 = vector.extract_strided_slice %1 {offsets = [0, 0, 0], sizes = [14, 14, 128], strides = [1, 1, 1]} : vector<16x14x128xf32> to vector<14x14x128xf32>
    %5 = vector.extract_strided_slice %3 {offsets = [0, 0, 0], sizes = [14, 14, 128], strides = [1, 1, 1]} : vector<16x14x128xf32> to vector<14x14x128xf32>
    %6 = arith.addf %4, %5 : vector<14x14x128xf32>
    %7 = vector.extract_strided_slice %1 {offsets = [2, 0, 0], sizes = [14, 14, 128], strides = [1, 1, 1]} : vector<16x14x128xf32> to vector<14x14x128xf32>
    %8 = arith.addf %6, %7 : vector<14x14x128xf32>
    %9 = vector.extract_strided_slice %3 {offsets = [2, 0, 0], sizes = [14, 14, 128], strides = [1, 1, 1]} : vector<16x14x128xf32> to vector<14x14x128xf32>
    %10 = arith.addf %8, %9 : vector<14x14x128xf32>
    %cst = arith.constant 6.250000e-02 : f32
    %11 = vector.broadcast %cst : f32 to vector<14x14x128xf32>
    %12 = arith.mulf %10, %11 : vector<14x14x128xf32>
    %13 = vector.extract_strided_slice %2 {offsets = [0, 0, 0], sizes = [14, 14, 128], strides = [1, 1, 1]} : vector<16x14x128xf32> to vector<14x14x128xf32>
    %14 = vector.extract_strided_slice %1 {offsets = [1, 0, 0], sizes = [14, 14, 128], strides = [1, 1, 1]} : vector<16x14x128xf32> to vector<14x14x128xf32>
    %15 = arith.addf %13, %14 : vector<14x14x128xf32>
    %16 = vector.extract_strided_slice %3 {offsets = [1, 0, 0], sizes = [14, 14, 128], strides = [1, 1, 1]} : vector<16x14x128xf32> to vector<14x14x128xf32>
    %17 = arith.addf %15, %16 : vector<14x14x128xf32>
    %18 = vector.extract_strided_slice %2 {offsets = [2, 0, 0], sizes = [14, 14, 128], strides = [1, 1, 1]} : vector<16x14x128xf32> to vector<14x14x128xf32>
    %19 = arith.addf %17, %18 : vector<14x14x128xf32>
    %cst_2 = arith.constant 1.250000e-01 : f32
    %20 = vector.broadcast %cst_2 : f32 to vector<14x14x128xf32>
    %21 = arith.mulf %19, %20 : vector<14x14x128xf32>
    %22 = arith.addf %12, %21 : vector<14x14x128xf32>
    %23 = vector.extract_strided_slice %2 {offsets = [1, 0, 0], sizes = [14, 14, 128], strides = [1, 1, 1]} : vector<16x14x128xf32> to vector<14x14x128xf32>
    %cst_3 = arith.constant 2.500000e-01 : f32
    %24 = vector.broadcast %cst_3 : f32 to vector<14x14x128xf32>
    %25 = arith.mulf %23, %24 : vector<14x14x128xf32>
    %26 = arith.addf %22, %25 : vector<14x14x128xf32>
    %c0_4 = arith.constant 0 : index
    %c0_5 = arith.constant 0 : index
    %c0_6 = arith.constant 0 : index
    %27 = vector.load %arg2[%c0_4, %c0_5, %c0_6] : memref<14x14x128xf32, #tpu.memory_space<vmem>>, vector<14x14x128xf32>
    tpu.vector_store %arg2[%c0_4, %c0_5, %c0_6], %26 {strides = array<i32>} : memref<14x14x128xf32, #tpu.memory_space<vmem>>, vector<14x14x128xf32>,
    return
  }
  func.func @transform_0(%arg0: i32) -> (i32, i32, i32) {
    %c0_i32 = arith.constant 0 : i32
    %c0_i32_0 = arith.constant 0 : i32
    %c0_i32_1 = arith.constant 0 : i32
    return %c0_i32, %c0_i32_0, %arg0 : i32, i32, i32
  }
  func.func @transform_1(%arg0: i32) -> (i32, i32, i32) {
    %c0_i32 = arith.constant 0 : i32
    %c0_i32_0 = arith.constant 0 : i32
    %c0_i32_1 = arith.constant 0 : i32
    return %c0_i32, %c0_i32_0, %arg0 : i32, i32, i32
  }
}

</mosaic_0001>

<bundles_post_ra>
// kernel: tpu_custom_call.1
= control target key start
LH: loop header
LB: loop body
LE: loop exit
PB: predicated region body
PF: predicated region fallthrough
CT: control target
= control target key end

     0   :  { %6 = vsyncpa [#allocation3], 0  ;;  %s1343_s0 = inlined_call_operand.hbm [shape: f32[16,16,128], index: 0, kind: input, shape index: {}]   ;;  %s1344_s1 = inlined_call_operand.hbm [shape: f32[14,14,128], index: 1, kind: output, shape index: {}]  }
   0x1   :  { %7 = vsyncpa [#allocation4], 0  ;;  %s911_s6 = smov [#allocation2]   ;;  %s863_s10 = scalar_lea.hbm %s1343_s0, 4096 }
   0x2   :  { %s13_s7 = sshll.u32 %s911_s6, 4  ;;  %p864_p0 = scmp.ne.s32.totalorder %s1343_s0, %s863_s10  ;;  %s14_s7 = int_to_ptr.vmem [resolvable:$true] %s13_s7 }
   0x3   :  { %p867_p1 = scmp.lt.u32.totalorder %s863_s10, %s1343_s0 }
   0x5   :  { %p869_p2 = pnand %p867_p1, %p864_p0 }
   0x7   :  { %872 = shalt.err (!%p869_p2)
}
   0x8   :  { %s873_s15 = scalar_lea.vmem %s14_s7, 4096  ;;  %p878_p4 = scmp.lt.s32.totalorder %s14_s7, %s14_s7 }
   0x9   :  { %p874_p3 = scmp.ne.s32.totalorder %s14_s7, %s873_s15  ;;  %p879_p5 = scmp.lt.s32.totalorder %s873_s15, %s873_s15 }
   0xb   :  { %p880_p6 = por %p879_p5, %p878_p4 }
   0xd   :  { %p881_p7 = pnand %p880_p6, %p874_p3 }
   0xf   :  { %884 = shalt.err (!%p881_p7)
}
  0x10   :  { %s912_s16 = smov 128   ;;  %s913_s17 = smov 8  }
  0x11   :  { %19 = dma.hbm_to_vmem [thread:$0]  %s1343_s0, 4096, %s14_s7, [#allocation3], %s912_s16, %s912_s16, %s913_s17  }
  0x12   :  { %907 = dma.done.wait [#allocation3], 4096  }
  0x13   :  { %908 = vsyncadd [#allocation3], 4294963200  ;;  %v23_v0 = vld [vmem:[#allocation2] sm:$0xff]  ;;  %v24_v1 = vld [vmem:[#allocation2 + $0x8] sm:$0xff]  ;;  %vm83_vm0 = vcmask 1045504   ;;  %vm280_vm1 = vcmask 1040384  }
  0x14   :  { %v25_v2 = vld [vmem:[#allocation2 + $0x10] sm:$0xff]  ;;  %vm379_vm2 = vcmask 1046528   ;;  %v26_v3 = vld [vmem:[#allocation2 + $0x18] sm:$0xff]  ;;  %v940_v4 = vld [vmem:[#allocation2 + $0x20] sm:$0xff]  ;;  %v84_v6 = vrot.slane %v23_v0, 2  ;;  %v85_v7 = vrot.slane %v24_v1, 2 }
  0x15   :  { %v942_v5 = vld [vmem:[#allocation2 + $0x28] sm:$0xff]  ;;  %v281_v8 = vrot.slane %v25_v2, 7  ;;  %v90_v9 = vrot.slane %v940_v4, 2  ;;  %v282_v11 = vrot.slane %v26_v3, 7  ;;  %v380_v12 = vrot.slane %v25_v2, 1  ;;  %v957_v35 = vld [vmem:[#allocation2 + $0x30] sm:$0xff] }
  0x16   :  { %v946_v10 = vrot.slane %v942_v5, 2  ;;  %v86_v13 = vsel %vm83_vm0, %v84_v6, %v85_v7  ;;  %v381_v15 = vrot.slane %v26_v3, 1  ;;  %v660_v16 = vmul.f32 0.25, %v25_v2  ;;  %v960_v37 = vld [vmem:[#allocation2 + $0x38] sm:$0xff]  ;;  %s914_s0 = smov [#allocation5]  }
  0x17   :  { %v351_v14 = vadd.f32 %v281_v8, %v23_v0  ;;  %v154_v17 = vadd.f32 %v86_v13, %v23_v0  ;;  %v283_v18 = vsel %vm280_vm1, %v281_v8, %v282_v11  ;;  %v661_v19 = vmul.f32 0.25, %v26_v3  ;;  %v982_v13 = vld [vmem:[#allocation2 + $0x40] sm:$0xff]  ;;  %s847_s20 = sshll.u32 %s914_s0, 4  ;;  %s848_s20 = int_to_ptr.vmem [resolvable:$true] %s847_s20 }
  0x18   :  { %v92_v20 = vsel %vm83_vm0, %v90_v9, %v946_v10  ;;  %v352_v21 = vadd.f32 %v283_v18, %v24_v1  ;;  %v382_v22 = vsel %vm379_vm2, %v380_v12, %v381_v15  ;;  %v716_v25 = vrot.slane %v660_v16, 1  ;;  %s885_s21 = scalar_lea.vmem %s848_s20, 3584  ;;  %p890_p9 = scmp.lt.s32.totalorder %s848_s20, %s848_s20 }
  0x19   :  { %v182_v23 = vadd.f32 %v154_v17, %v940_v4  ;;  %v450_v24 = vadd.f32 %v382_v22, %v351_v14  ;;  %v155_v26 = vadd.f32 %v85_v7, %v24_v1  ;;  %v717_v28 = vrot.slane %v661_v19, 1  ;;  %v986_v17 = vld [vmem:[#allocation2 + $0x48] sm:$0xff]  ;;  %p886_p8 = scmp.ne.s32.totalorder %s848_s20, %s885_s21  ;;  %p891_p10 = scmp.lt.s32.totalorder %s885_s21, %s885_s21 }
  0x1a   :  { %v451_v27 = vadd.f32 %v381_v15, %v352_v21  ;;  %v87_v29 = vrot.slane %v25_v2, 2  ;;  %v88_v30 = vrot.slane %v26_v3, 2  ;;  %v158_v31 = vadd.f32 %v92_v20, %v940_v4 }
  0x1b   :  { %v224_v32 = vadd.f32 %v182_v23, %v92_v20  ;;  %v478_v33 = vadd.f32 %v450_v24, %v940_v4  ;;  %v183_v34 = vadd.f32 %v155_v26, %v942_v5  ;;  %v93_v39 = vrot.slane %v957_v35, 2  ;;  %p892_p11 = por %p891_p10, %p890_p9 }
  0x1c   :  { %v479_v36 = vadd.f32 %v451_v27, %v942_v5  ;;  %v89_v38 = vsel %vm83_vm0, %v87_v29, %v88_v30  ;;  %v284_v40 = vrot.slane %v940_v4, 7  ;;  %v967_v43 = vrot.slane %v960_v37, 2 }
  0x1d   :  { %v506_v41 = vmul.f32 0.125, %v478_v33  ;;  %v225_v42 = vadd.f32 %v183_v34, %v946_v10  ;;  %v156_v44 = vadd.f32 %v89_v38, %v25_v2  ;;  %v252_v45 = vmul.f32 0.0625, %v224_v32  ;;  %p893_p12 = pnand %p892_p11, %p886_p8 }
  0x1e   :  { %v507_v46 = vmul.f32 0.125, %v479_v36  ;;  %v718_v47 = vsel %vm379_vm2, %v716_v25, %v717_v28  ;;  %v285_v48 = vrot.slane %v942_v5, 7  ;;  %v353_v52 = vadd.f32 %v284_v40, %v25_v2 }
  0x1f   :  { %v562_v49 = vrot.slane %v506_v41, 1  ;;  %v253_v50 = vmul.f32 0.0625, %v225_v42  ;;  %v184_v51 = vadd.f32 %v156_v44, %v957_v35  ;;  %v383_v55 = vrot.slane %v940_v4, 1 }
  0x20   :  { %v563_v53 = vrot.slane %v507_v46, 1  ;;  %v286_v54 = vsel %vm280_vm1, %v284_v40, %v285_v48  ;;  %v384_v56 = vrot.slane %v942_v5, 1  ;;  %v95_v57 = vsel %vm83_vm0, %v93_v39, %v967_v43 }
  0x21   :  { %v354_v58 = vadd.f32 %v286_v54, %v26_v3  ;;  %v662_v59 = vmul.f32 0.25, %v940_v4  ;;  %v663_v60 = vmul.f32 0.25, %v942_v5  ;;  %v157_v0 = vadd.f32 %v88_v30, %v26_v3 }
  0x22   :  { %v564_v61 = vsel %vm379_vm2, %v562_v49, %v563_v53  ;;  %v633_v62 = vadd.f32 %v563_v53, %v253_v50  ;;  %v385_v63 = vsel %vm379_vm2, %v383_v55, %v384_v56  ;;  %v226_v2 = vadd.f32 %v184_v51, %v95_v57  ;;  %v1009_v49 = vld [vmem:[#allocation2 + $0x50] sm:$0xff] }
  0x23   :  { %v632_v1 = vadd.f32 %v564_v61, %v252_v45  ;;  %v452_v6 = vadd.f32 %v385_v63, %v353_v52  ;;  %v453_v7 = vadd.f32 %v384_v56, %v354_v58  ;;  %v719_v9 = vrot.slane %v662_v59, 1  ;;  %v1013_v52 = vld [vmem:[#allocation2 + $0x58] sm:$0xff] }
  0x24   :  { %v787_v8 = vadd.f32 %v717_v28, %v633_v62  ;;  %v720_v11 = vrot.slane %v663_v60, 1  ;;  %v185_v12 = vadd.f32 %v157_v0, %v960_v37  ;;  %v96_v3 = vrot.slane %v982_v13, 2 }
  0x25   :  { %v786_v14 = vadd.f32 %v718_v47, %v632_v1  ;;  %v480_v15 = vadd.f32 %v452_v6, %v957_v35  ;;  %v481_v16 = vadd.f32 %v453_v7, %v960_v37  ;;  %v160_v18 = vadd.f32 %v95_v57, %v957_v35 }
  0x26   :  { %815 = vst [vmem:[#allocation5 + $0x8] sm:$0x3f] %v787_v8  ;;  %v227_v19 = vadd.f32 %v185_v12, %v967_v43  ;;  %v992_v20 = vrot.slane %v986_v17, 2  ;;  %v186_v21 = vadd.f32 %v158_v31, %v982_v13  ;;  %v287_v24 = vrot.slane %v957_v35, 7 }
  0x27   :  { %814 = vst [vmem:[#allocation5] sm:$0xff] %v786_v14  ;;  %v508_v22 = vmul.f32 0.125, %v480_v15  ;;  %v509_v23 = vmul.f32 0.125, %v481_v16  ;;  %v288_v25 = vrot.slane %v960_v37, 7  ;;  %v254_v26 = vmul.f32 0.0625, %v226_v2 }
  0x28   :  { %v255_v27 = vmul.f32 0.0625, %v227_v19  ;;  %v386_v28 = vrot.slane %v957_v35, 1  ;;  %v387_v29 = vrot.slane %v960_v37, 1  ;;  %v721_v33 = vsel %vm379_vm2, %v719_v9, %v720_v11 }
  0x29   :  { %v565_v30 = vrot.slane %v508_v22, 1  ;;  %v566_v32 = vrot.slane %v509_v23, 1  ;;  %v98_v31 = vsel %vm83_vm0, %v96_v3, %v992_v20  ;;  %v289_v34 = vsel %vm280_vm1, %v287_v24, %v288_v25  ;;  %v1039_v22 = vld [vmem:[#allocation2 + $0x60] sm:$0xff]  ;;  %v1041_v23 = vld [vmem:[#allocation2 + $0x68] sm:$0xff] }
  0x2a   :  { %v355_v36 = vadd.f32 %v287_v24, %v940_v4  ;;  %v388_v38 = vsel %vm379_vm2, %v386_v28, %v387_v29  ;;  %v664_v39 = vmul.f32 0.25, %v957_v35  ;;  %v228_v42 = vadd.f32 %v186_v21, %v98_v31 }
  0x2b   :  { %v567_v40 = vsel %vm379_vm2, %v565_v30, %v566_v32  ;;  %v635_v41 = vadd.f32 %v566_v32, %v255_v27  ;;  %v356_v44 = vadd.f32 %v289_v34, %v942_v5  ;;  %v665_v47 = vmul.f32 0.25, %v960_v37 }
  0x2c   :  { %v634_v45 = vadd.f32 %v567_v40, %v254_v26  ;;  %v454_v46 = vadd.f32 %v388_v38, %v355_v36  ;;  %v722_v48 = vrot.slane %v664_v39, 1  ;;  %v159_v4 = vadd.f32 %v946_v10, %v942_v5 }
  0x2d   :  { %v789_v50 = vadd.f32 %v720_v11, %v635_v41  ;;  %v455_v51 = vadd.f32 %v387_v29, %v356_v44  ;;  %v99_v53 = vrot.slane %v1009_v49, 2  ;;  %v723_v56 = vrot.slane %v665_v47, 1 }
  0x2e   :  { %v788_v54 = vadd.f32 %v721_v33, %v634_v45  ;;  %v482_v55 = vadd.f32 %v454_v46, %v982_v13  ;;  %v1018_v57 = vrot.slane %v1013_v52, 2  ;;  %v187_v59 = vadd.f32 %v159_v4, %v986_v17 }
  0x2f   :  { %817 = vst [vmem:[#allocation5 + $0x18] sm:$0x3f] %v789_v50  ;;  %v483_v58 = vadd.f32 %v455_v51, %v986_v17  ;;  %v188_v60 = vadd.f32 %v160_v18, %v1009_v49  ;;  %v290_v5 = vrot.slane %v982_v13, 7  ;;  %v162_v10 = vadd.f32 %v98_v31, %v982_v13 }
  0x30   :  { %816 = vst [vmem:[#allocation5 + $0x10] sm:$0xff] %v788_v54  ;;  %v256_v61 = vmul.f32 0.0625, %v228_v42  ;;  %v510_v62 = vmul.f32 0.125, %v482_v55  ;;  %v291_v63 = vrot.slane %v986_v17, 7  ;;  %v724_v1 = vsel %vm379_vm2, %v722_v48, %v723_v56 }
  0x31   :  { %v511_v0 = vmul.f32 0.125, %v483_v58  ;;  %v229_v2 = vadd.f32 %v187_v59, %v992_v20  ;;  %v101_v6 = vsel %vm83_vm0, %v99_v53, %v1018_v57  ;;  %v389_v11 = vrot.slane %v982_v13, 1 }
  0x32   :  { %v568_v7 = vrot.slane %v510_v62, 1  ;;  %v230_v8 = vadd.f32 %v188_v60, %v101_v6  ;;  %v292_v9 = vsel %vm280_vm1, %v290_v5, %v291_v63  ;;  %v357_v15 = vadd.f32 %v290_v5, %v957_v35 }
  0x33   :  { %v569_v12 = vrot.slane %v511_v0, 1  ;;  %v257_v14 = vmul.f32 0.0625, %v229_v2  ;;  %v358_v16 = vadd.f32 %v292_v9, %v960_v37  ;;  %v390_v3 = vrot.slane %v986_v17, 1  ;;  %v1070_v0 = vld [vmem:[#allocation2 + $0x70] sm:$0xff] }
  0x34   :  { %v666_v18 = vmul.f32 0.25, %v982_v13  ;;  %v667_v19 = vmul.f32 0.25, %v986_v17  ;;  %v161_v21 = vadd.f32 %v967_v43, %v960_v37  ;;  %v102_v35 = vrot.slane %v1039_v22, 2 }
  0x35   :  { %v570_v24 = vsel %vm379_vm2, %v568_v7, %v569_v12  ;;  %v637_v25 = vadd.f32 %v569_v12, %v257_v14  ;;  %v1046_v26 = vrot.slane %v1041_v23, 2  ;;  %v391_v28 = vsel %vm379_vm2, %v389_v11, %v390_v3  ;;  %v1075_v12 = vld [vmem:[#allocation2 + $0x78] sm:$0xff] }
  0x36   :  { %v636_v27 = vadd.f32 %v570_v24, %v256_v61  ;;  %v457_v29 = vadd.f32 %v390_v3, %v358_v16  ;;  %v725_v30 = vrot.slane %v666_v18, 1  ;;  %v456_v33 = vadd.f32 %v391_v28, %v357_v15 }
  0x37   :  { %v791_v32 = vadd.f32 %v723_v56, %v637_v25  ;;  %v726_v37 = vrot.slane %v667_v19, 1  ;;  %v189_v43 = vadd.f32 %v161_v21, %v1013_v52  ;;  %v164_v34 = vadd.f32 %v101_v6, %v1009_v49 }
  0x38   :  { %v790_v31 = vadd.f32 %v724_v1, %v636_v27  ;;  %v485_v36 = vadd.f32 %v457_v29, %v1013_v52  ;;  %v190_v38 = vadd.f32 %v162_v10, %v1039_v22  ;;  %v258_v39 = vmul.f32 0.0625, %v230_v8 }
  0x39   :  { %819 = vst [vmem:[#allocation5 + $0x28] sm:$0x3f] %v791_v32  ;;  %v484_v40 = vadd.f32 %v456_v33, %v1009_v49  ;;  %v231_v41 = vadd.f32 %v189_v43, %v1018_v57  ;;  %v104_v42 = vsel %vm83_vm0, %v102_v35, %v1046_v26  ;;  %v727_v45 = vsel %vm379_vm2, %v725_v30, %v726_v37 }
  0x3a   :  { %818 = vst [vmem:[#allocation5 + $0x20] sm:$0xff] %v790_v31  ;;  %v513_v44 = vmul.f32 0.125, %v485_v36  ;;  %v293_v46 = vrot.slane %v1009_v49, 7  ;;  %v294_v47 = vrot.slane %v1013_v52, 7  ;;  %v392_v51 = vrot.slane %v1009_v49, 1 }
  0x3b   :  { %v512_v48 = vmul.f32 0.125, %v484_v40  ;;  %v259_v50 = vmul.f32 0.0625, %v231_v41  ;;  %v393_v4 = vrot.slane %v1013_v52, 1  ;;  %v232_v54 = vadd.f32 %v190_v38, %v104_v42 }
  0x3c   :  { %v572_v53 = vrot.slane %v513_v44, 1  ;;  %v295_v55 = vsel %vm280_vm1, %v293_v46, %v294_v47  ;;  %v359_v56 = vadd.f32 %v293_v46, %v982_v13  ;;  %v668_v5 = vmul.f32 0.25, %v1009_v49 }
  0x3d   :  { %v571_v58 = vrot.slane %v512_v48, 1  ;;  %v360_v59 = vadd.f32 %v295_v55, %v986_v17  ;;  %v394_v60 = vsel %vm379_vm2, %v392_v51, %v393_v4  ;;  %v669_v62 = vmul.f32 0.25, %v1013_v52  ;;  %v1104_v55 = vld [vmem:[#allocation2 + $0x80] sm:$0xff] }
  0x3e   :  { %v639_v10 = vadd.f32 %v572_v53, %v259_v50  ;;  %v458_v61 = vadd.f32 %v394_v60, %v359_v56  ;;  %v163_v63 = vadd.f32 %v992_v20, %v986_v17  ;;  %v728_v13 = vrot.slane %v668_v5, 1  ;;  %v1106_v56 = vld [vmem:[#allocation2 + $0x88] sm:$0xff] }
  0x3f   :  { %v573_v1 = vsel %vm379_vm2, %v571_v58, %v572_v53  ;;  %v459_v2 = vadd.f32 %v393_v4, %v360_v59  ;;  %v105_v6 = vrot.slane %v1070_v0, 2  ;;  %v729_v11 = vrot.slane %v669_v62, 1 }
  0x40   :  { %v638_v7 = vadd.f32 %v573_v1, %v258_v39  ;;  %v793_v8 = vadd.f32 %v726_v37, %v639_v10  ;;  %v486_v9 = vadd.f32 %v458_v61, %v1039_v22  ;;  %v166_v14 = vadd.f32 %v104_v42, %v1039_v22 }
  0x41   :  { %v487_v15 = vadd.f32 %v459_v2, %v1041_v23  ;;  %v191_v17 = vadd.f32 %v163_v63, %v1041_v23  ;;  %v1081_v20 = vrot.slane %v1075_v12, 2  ;;  %v192_v18 = vadd.f32 %v164_v34, %v1070_v0 }
  0x42   :  { %v792_v16 = vadd.f32 %v727_v45, %v638_v7  ;;  %821 = vst [vmem:[#allocation5 + $0x38] sm:$0x3f] %v793_v8  ;;  %v514_v3 = vmul.f32 0.125, %v486_v9  ;;  %v296_v19 = vrot.slane %v1039_v22, 7  ;;  %v260_v21 = vmul.f32 0.0625, %v232_v54 }
  0x43   :  { %v515_v24 = vmul.f32 0.125, %v487_v15  ;;  %v233_v25 = vadd.f32 %v191_v17, %v1046_v26  ;;  %v297_v35 = vrot.slane %v1041_v23, 7  ;;  %v730_v28 = vsel %vm379_vm2, %v728_v13, %v729_v11 }
  0x44   :  { %820 = vst [vmem:[#allocation5 + $0x30] sm:$0xff] %v792_v16  ;;  %v574_v27 = vrot.slane %v514_v3, 1  ;;  %v107_v29 = vsel %vm83_vm0, %v105_v6, %v1081_v20  ;;  %v361_v30 = vadd.f32 %v296_v19, %v1009_v49  ;;  %v395_v43 = vrot.slane %v1039_v22, 1 }
  0x45   :  { %v575_v32 = vrot.slane %v515_v24, 1  ;;  %v261_v33 = vmul.f32 0.0625, %v233_v25  ;;  %v298_v37 = vsel %vm280_vm1, %v296_v19, %v297_v35  ;;  %v234_v31 = vadd.f32 %v192_v18, %v107_v29 }
  0x46   :  { %v362_v34 = vadd.f32 %v298_v37, %v1013_v52  ;;  %v396_v36 = vrot.slane %v1041_v23, 1  ;;  %v670_v38 = vmul.f32 0.25, %v1039_v22  ;;  %v671_v41 = vmul.f32 0.25, %v1041_v23  ;;  %v1135_v37 = vld [vmem:[#allocation2 + $0x98] sm:$0xff] }
  0x47   :  { %v576_v39 = vsel %vm379_vm2, %v574_v27, %v575_v32  ;;  %v641_v40 = vadd.f32 %v575_v32, %v261_v33  ;;  %v165_v49 = vadd.f32 %v1018_v57, %v1013_v52  ;;  %v168_v53 = vadd.f32 %v107_v29, %v1070_v0  ;;  %v1131_v29 = vld [vmem:[#allocation2 + $0x90] sm:$0xff] }
  0x48   :  { %v640_v42 = vadd.f32 %v576_v39, %v260_v21  ;;  %v397_v44 = vsel %vm379_vm2, %v395_v43, %v396_v36  ;;  %v461_v45 = vadd.f32 %v396_v36, %v362_v34  ;;  %v731_v46 = vrot.slane %v670_v38, 1 }
  0x49   :  { %v795_v47 = vadd.f32 %v729_v11, %v641_v40  ;;  %v460_v48 = vadd.f32 %v397_v44, %v361_v30  ;;  %v732_v50 = vrot.slane %v671_v41, 1  ;;  %v193_v51 = vadd.f32 %v165_v49, %v1075_v12 }
  0x4a   :  { %v794_v4 = vadd.f32 %v730_v28, %v640_v42  ;;  %v489_v54 = vadd.f32 %v461_v45, %v1075_v12  ;;  %v108_v58 = vrot.slane %v1104_v55, 2  ;;  %v1112_v59 = vrot.slane %v1106_v56, 2 }
  0x4b   :  { %823 = vst [vmem:[#allocation5 + $0x48] sm:$0x3f] %v795_v47  ;;  %v488_v52 = vadd.f32 %v460_v48, %v1070_v0  ;;  %v235_v57 = vadd.f32 %v193_v51, %v1081_v20  ;;  %v262_v60 = vmul.f32 0.0625, %v234_v31  ;;  %v299_v10 = vrot.slane %v1070_v0, 7 }
  0x4c   :  { %822 = vst [vmem:[#allocation5 + $0x40] sm:$0xff] %v794_v4  ;;  %v517_v5 = vmul.f32 0.125, %v489_v54  ;;  %v300_v61 = vrot.slane %v1075_v12, 7  ;;  %v733_v63 = vsel %vm379_vm2, %v731_v46, %v732_v50  ;;  %v194_v2 = vadd.f32 %v166_v14, %v1104_v55 }
  0x4d   :  { %v516_v62 = vmul.f32 0.125, %v488_v52  ;;  %v263_v1 = vmul.f32 0.0625, %v235_v57  ;;  %v363_v7 = vadd.f32 %v299_v10, %v1039_v22  ;;  %v398_v8 = vrot.slane %v1070_v0, 1 }
  0x4e   :  { %v578_v13 = vrot.slane %v517_v5, 1  ;;  %v301_v6 = vsel %vm280_vm1, %v299_v10, %v300_v61  ;;  %v110_v11 = vsel %vm83_vm0, %v108_v58, %v1112_v59  ;;  %v399_v17 = vrot.slane %v1075_v12, 1 }
  0x4f   :  { %v577_v9 = vrot.slane %v516_v62, 1  ;;  %v364_v15 = vadd.f32 %v301_v6, %v1041_v23  ;;  %v672_v3 = vmul.f32 0.25, %v1070_v0  ;;  %v673_v14 = vmul.f32 0.25, %v1075_v12 }
  0x50   :  { %v643_v16 = vadd.f32 %v578_v13, %v263_v1  ;;  %v167_v18 = vadd.f32 %v1046_v26, %v1041_v23  ;;  %v236_v19 = vadd.f32 %v194_v2, %v110_v11  ;;  %v400_v21 = vsel %vm379_vm2, %v398_v8, %v399_v17  ;;  %v1161_v2 = vld [vmem:[#allocation2 + $0xa0] sm:$0xff]  ;;  %v1164_v8 = vld [vmem:[#allocation2 + $0xa8] sm:$0xff] }
  0x51   :  { %v579_v22 = vsel %vm379_vm2, %v577_v9, %v578_v13  ;;  %v463_v24 = vadd.f32 %v399_v17, %v364_v15  ;;  %v462_v27 = vadd.f32 %v400_v21, %v363_v7  ;;  %v734_v28 = vrot.slane %v672_v3, 1 }
  0x52   :  { %v642_v25 = vadd.f32 %v579_v22, %v262_v60  ;;  %v797_v35 = vadd.f32 %v732_v50, %v643_v16  ;;  %v735_v32 = vrot.slane %v673_v14, 1  ;;  %v195_v33 = vadd.f32 %v167_v18, %v1106_v56 }
  0x53   :  { %v491_v30 = vadd.f32 %v463_v24, %v1106_v56  ;;  %v111_v23 = vrot.slane %v1131_v29, 2  ;;  %v490_v43 = vadd.f32 %v462_v27, %v1104_v55  ;;  %v1140_v31 = vrot.slane %v1135_v37, 2 }
  0x54   :  { %v796_v26 = vadd.f32 %v733_v63, %v642_v25  ;;  %825 = vst [vmem:[#allocation5 + $0x58] sm:$0x3f] %v797_v35  ;;  %v302_v34 = vrot.slane %v1104_v55, 7  ;;  %v170_v36 = vadd.f32 %v110_v11, %v1104_v55  ;;  %v264_v38 = vmul.f32 0.0625, %v236_v19 }
  0x55   :  { %v519_v39 = vmul.f32 0.125, %v491_v30  ;;  %v237_v40 = vadd.f32 %v195_v33, %v1112_v59  ;;  %v518_v41 = vmul.f32 0.125, %v490_v43  ;;  %v736_v49 = vsel %vm379_vm2, %v734_v28, %v735_v32 }
  0x56   :  { %824 = vst [vmem:[#allocation5 + $0x50] sm:$0xff] %v796_v26  ;;  %v196_v42 = vadd.f32 %v168_v53, %v1131_v29  ;;  %v303_v44 = vrot.slane %v1106_v56, 7  ;;  %v365_v47 = vadd.f32 %v302_v34, %v1070_v0  ;;  %v401_v48 = vrot.slane %v1104_v55, 1 }
  0x57   :  { %v581_v45 = vrot.slane %v519_v39, 1  ;;  %v265_v46 = vmul.f32 0.0625, %v237_v40  ;;  %v580_v50 = vrot.slane %v518_v41, 1  ;;  %v113_v51 = vsel %vm83_vm0, %v111_v23, %v1140_v31 }
  0x58   :  { %v304_v4 = vsel %vm280_vm1, %v302_v34, %v303_v44  ;;  %v402_v54 = vrot.slane %v1106_v56, 1  ;;  %v674_v53 = vmul.f32 0.25, %v1104_v55  ;;  %v675_v58 = vmul.f32 0.25, %v1106_v56 }
  0x59   :  { %v645_v52 = vadd.f32 %v581_v45, %v265_v46  ;;  %v366_v57 = vadd.f32 %v304_v4, %v1075_v12  ;;  %v582_v60 = vsel %vm379_vm2, %v580_v50, %v581_v45  ;;  %v238_v0 = vadd.f32 %v196_v42, %v113_v51  ;;  %v1196_v4 = vld [vmem:[#allocation2 + $0xb8] sm:$0xff] }
  0x5a   :  { %v403_v5 = vsel %vm379_vm2, %v401_v48, %v402_v54  ;;  %v169_v10 = vadd.f32 %v1081_v20, %v1075_v12  ;;  %v644_v61 = vadd.f32 %v582_v60, %v264_v38  ;;  %v737_v13 = vrot.slane %v674_v53, 1  ;;  %v1192_v48 = vld [vmem:[#allocation2 + $0xb0] sm:$0xff] }
  0x5b   :  { %v799_v62 = vadd.f32 %v735_v32, %v645_v52  ;;  %v464_v63 = vadd.f32 %v403_v5, %v365_v47  ;;  %v465_v1 = vadd.f32 %v402_v54, %v366_v57  ;;  %v738_v6 = vrot.slane %v675_v58, 1 }
  0x5c   :  { %v197_v7 = vadd.f32 %v169_v10, %v1135_v37  ;;  %v114_v9 = vrot.slane %v1161_v2, 2  ;;  %v798_v11 = vadd.f32 %v736_v49, %v644_v61  ;;  %v1170_v20 = vrot.slane %v1164_v8, 2 }
  0x5d   :  { %827 = vst [vmem:[#allocation5 + $0x68] sm:$0x3f] %v799_v62  ;;  %v492_v15 = vadd.f32 %v464_v63, %v1131_v29  ;;  %v493_v12 = vadd.f32 %v465_v1, %v1135_v37  ;;  %v172_v17 = vadd.f32 %v113_v51, %v1131_v29  ;;  %v266_v16 = vmul.f32 0.0625, %v238_v0 }
  0x5e   :  { %v239_v3 = vadd.f32 %v197_v7, %v1140_v31  ;;  %v305_v14 = vrot.slane %v1131_v29, 7  ;;  %826 = vst [vmem:[#allocation5 + $0x60] sm:$0xff] %v798_v11  ;;  %v739_v19 = vsel %vm379_vm2, %v737_v13, %v738_v6  ;;  %v198_v21 = vadd.f32 %v170_v36, %v1161_v2 }
  0x5f   :  { %v520_v18 = vmul.f32 0.125, %v492_v15  ;;  %v521_v22 = vmul.f32 0.125, %v493_v12  ;;  %v306_v25 = vrot.slane %v1135_v37, 7  ;;  %v404_v27 = vrot.slane %v1131_v29, 1 }
  0x60   :  { %v267_v24 = vmul.f32 0.0625, %v239_v3  ;;  %v367_v35 = vadd.f32 %v305_v14, %v1104_v55  ;;  %v116_v32 = vsel %vm83_vm0, %v114_v9, %v1170_v20  ;;  %v405_v33 = vrot.slane %v1135_v37, 1 }
  0x61   :  { %v583_v28 = vrot.slane %v520_v18, 1  ;;  %v584_v30 = vrot.slane %v521_v22, 1  ;;  %v307_v23 = vsel %vm280_vm1, %v305_v14, %v306_v25  ;;  %v676_v26 = vmul.f32 0.25, %v1131_v29 }
  0x62   :  { %v677_v43 = vmul.f32 0.25, %v1135_v37  ;;  %v171_v34 = vadd.f32 %v1112_v59, %v1106_v56  ;;  %v368_v38 = vadd.f32 %v307_v23, %v1106_v56  ;;  %v406_v39 = vsel %vm379_vm2, %v404_v27, %v405_v33 }
  0x63   :  { %v585_v55 = vsel %vm379_vm2, %v583_v28, %v584_v30  ;;  %v647_v36 = vadd.f32 %v584_v30, %v267_v24  ;;  %v240_v41 = vadd.f32 %v198_v21, %v116_v32  ;;  %v466_v49 = vadd.f32 %v406_v39, %v367_v35 }
  0x64   :  { %v646_v40 = vadd.f32 %v585_v55, %v266_v16  ;;  %v740_v42 = vrot.slane %v676_v26, 1  ;;  %v467_v45 = vadd.f32 %v405_v33, %v368_v38  ;;  %v741_v46 = vrot.slane %v677_v43, 1  ;;  %v1225_v33 = vld [vmem:[#allocation2 + $0xc0] sm:$0xff] }
  0x65   :  { %v801_v44 = vadd.f32 %v738_v6, %v647_v36  ;;  %v199_v47 = vadd.f32 %v171_v34, %v1164_v8  ;;  %v174_v59 = vadd.f32 %v116_v32, %v1161_v2  ;;  %v494_v51 = vadd.f32 %v466_v49, %v1161_v2 }
  0x66   :  { %v800_v50 = vadd.f32 %v739_v19, %v646_v40  ;;  %v117_v56 = vrot.slane %v1192_v48, 2  ;;  %v495_v54 = vadd.f32 %v467_v45, %v1164_v8  ;;  %v1202_v57 = vrot.slane %v1196_v4, 2 }
  0x67   :  { %829 = vst [vmem:[#allocation5 + $0x78] sm:$0x3f] %v801_v44  ;;  %v241_v52 = vadd.f32 %v199_v47, %v1170_v20  ;;  %v308_v53 = vrot.slane %v1161_v2, 7  ;;  %v522_v58 = vmul.f32 0.125, %v494_v51  ;;  %v200_v60 = vadd.f32 %v172_v17, %v1192_v48 }
  0x68   :  { %828 = vst [vmem:[#allocation5 + $0x70] sm:$0xff] %v800_v50  ;;  %v309_v0 = vrot.slane %v1164_v8, 7  ;;  %v407_v5 = vrot.slane %v1161_v2, 1  ;;  %v268_v10 = vmul.f32 0.0625, %v240_v41  ;;  %v523_v61 = vmul.f32 0.125, %v495_v54 }
  0x69   :  { %v742_v62 = vsel %vm379_vm2, %v740_v42, %v741_v46  ;;  %v269_v63 = vmul.f32 0.0625, %v241_v52  ;;  %v586_v1 = vrot.slane %v522_v58, 1  ;;  %v369_v6 = vadd.f32 %v308_v53, %v1131_v29 }
  0x6a   :  { %v310_v13 = vsel %vm280_vm1, %v308_v53, %v309_v0  ;;  %v408_v7 = vrot.slane %v1164_v8, 1  ;;  %v587_v9 = vrot.slane %v523_v61, 1  ;;  %v119_v11 = vsel %vm83_vm0, %v117_v56, %v1202_v57 }
  0x6b   :  { %v370_v15 = vadd.f32 %v310_v13, %v1135_v37  ;;  %v678_v12 = vmul.f32 0.25, %v1161_v2  ;;  %v242_v17 = vadd.f32 %v200_v60, %v119_v11  ;;  %v679_v3 = vmul.f32 0.25, %v1164_v8 }
  0x6c   :  { %v409_v16 = vsel %vm379_vm2, %v407_v5, %v408_v7  ;;  %v173_v14 = vadd.f32 %v1140_v31, %v1135_v37  ;;  %v588_v29 = vsel %vm379_vm2, %v586_v1, %v587_v9  ;;  %v649_v18 = vadd.f32 %v587_v9, %v269_v63  ;;  %v1227_v37 = vld [vmem:[#allocation2 + $0xc8] sm:$0xff]  ;;  %v1251_v63 = vld [vmem:[#allocation2 + $0xd0] sm:$0xff]  ;;  %v1253_v1 = vld [vmem:[#allocation2 + $0xd8] sm:$0xff] }
  0x6d   :  { %v468_v22 = vadd.f32 %v409_v16, %v369_v6  ;;  %v469_v19 = vadd.f32 %v408_v7, %v370_v15  ;;  %v648_v21 = vadd.f32 %v588_v29, %v268_v10  ;;  %v743_v24 = vrot.slane %v678_v12, 1 }
  0x6e   :  { %v744_v25 = vrot.slane %v679_v3, 1  ;;  %v201_v35 = vadd.f32 %v173_v14, %v1196_v4  ;;  %v803_v27 = vadd.f32 %v741_v46, %v649_v18  ;;  %v176_v28 = vadd.f32 %v119_v11, %v1192_v48 }
  0x6f   :  { %v496_v30 = vadd.f32 %v468_v22, %v1192_v48  ;;  %v497_v32 = vadd.f32 %v469_v19, %v1196_v4  ;;  %v802_v31 = vadd.f32 %v742_v62, %v648_v21  ;;  %v120_v26 = vrot.slane %v1225_v33, 2 }
  0x70   :  { %v243_v23 = vadd.f32 %v201_v35, %v1202_v57  ;;  %v1232_v43 = vrot.slane %v1227_v37, 2  ;;  %831 = vst [vmem:[#allocation5 + $0x88] sm:$0x3f] %v803_v27  ;;  %v270_v34 = vmul.f32 0.0625, %v242_v17  ;;  %v311_v38 = vrot.slane %v1192_v48, 7 }
  0x71   :  { %v524_v55 = vmul.f32 0.125, %v496_v30  ;;  %v525_v36 = vmul.f32 0.125, %v497_v32  ;;  %830 = vst [vmem:[#allocation5 + $0x80] sm:$0xff] %v802_v31  ;;  %v745_v39 = vsel %vm379_vm2, %v743_v24, %v744_v25  ;;  %v202_v41 = vadd.f32 %v174_v59, %v1225_v33 }
  0x72   :  { %v271_v40 = vmul.f32 0.0625, %v243_v23  ;;  %v312_v49 = vrot.slane %v1196_v4, 7  ;;  %v371_v45 = vadd.f32 %v311_v38, %v1161_v2  ;;  %v410_v46 = vrot.slane %v1192_v48, 1 }
  0x73   :  { %v589_v42 = vrot.slane %v524_v55, 1  ;;  %v590_v44 = vrot.slane %v525_v36, 1  ;;  %v122_v47 = vsel %vm83_vm0, %v120_v26, %v1232_v43  ;;  %v411_v51 = vrot.slane %v1196_v4, 1 }
  0x74   :  { %v313_v50 = vsel %vm280_vm1, %v311_v38, %v312_v49  ;;  %v680_v56 = vmul.f32 0.25, %v1192_v48  ;;  %v681_v53 = vmul.f32 0.25, %v1196_v4  ;;  %v244_v2 = vadd.f32 %v202_v41, %v122_v47 }
  0x75   :  { %v591_v54 = vsel %vm379_vm2, %v589_v42, %v590_v44  ;;  %v651_v59 = vadd.f32 %v590_v44, %v271_v40  ;;  %v372_v52 = vadd.f32 %v313_v50, %v1164_v8  ;;  %v412_v60 = vsel %vm379_vm2, %v410_v46, %v411_v51 }
  0x76   :  { %v650_v58 = vadd.f32 %v591_v54, %v270_v34  ;;  %v175_v0 = vadd.f32 %v1170_v20, %v1164_v8  ;;  %v470_v10 = vadd.f32 %v412_v60, %v371_v45  ;;  %v746_v62 = vrot.slane %v680_v56, 1 }
  0x77   :  { %v805_v5 = vadd.f32 %v744_v25, %v651_v59  ;;  %v471_v61 = vadd.f32 %v411_v51, %v372_v52  ;;  %v123_v7 = vrot.slane %v1251_v63, 2  ;;  %v1258_v9 = vrot.slane %v1253_v1, 2 }
  0x78   :  { %v804_v13 = vadd.f32 %v745_v39, %v650_v58  ;;  %v203_v6 = vadd.f32 %v175_v0, %v1227_v37  ;;  %v498_v11 = vadd.f32 %v470_v10, %v1225_v33  ;;  %v747_v20 = vrot.slane %v681_v53, 1  ;;  %v1280_v39 = vld [vmem:[#allocation2 + $0xe0] sm:$0xff] }
  0x79   :  { %833 = vst [vmem:[#allocation5 + $0x98] sm:$0x3f] %v805_v5  ;;  %v499_v8 = vadd.f32 %v471_v61, %v1227_v37  ;;  %v204_v15 = vadd.f32 %v176_v28, %v1251_v63  ;;  %v125_v17 = vsel %vm83_vm0, %v123_v7, %v1258_v9  ;;  %v314_v16 = vrot.slane %v1225_v33, 7 }
  0x7a   :  { %832 = vst [vmem:[#allocation5 + $0x90] sm:$0xff] %v804_v13  ;;  %v245_v12 = vadd.f32 %v203_v6, %v1232_v43  ;;  %v315_v3 = vrot.slane %v1227_v37, 7  ;;  %v178_v14 = vadd.f32 %v122_v47, %v1225_v33  ;;  %v526_v29 = vmul.f32 0.125, %v498_v11 }
  0x7b   :  { %v527_v18 = vmul.f32 0.125, %v499_v8  ;;  %v246_v22 = vadd.f32 %v204_v15, %v125_v17  ;;  %v272_v19 = vmul.f32 0.0625, %v244_v2  ;;  %v413_v25 = vrot.slane %v1225_v33, 1 }
  0x7c   :  { %v273_v21 = vmul.f32 0.0625, %v245_v12  ;;  %v316_v24 = vsel %vm280_vm1, %v314_v16, %v315_v3  ;;  %v592_v35 = vrot.slane %v526_v29, 1  ;;  %v373_v28 = vadd.f32 %v314_v16, %v1192_v48 }
  0x7d   :  { %v593_v27 = vrot.slane %v527_v18, 1  ;;  %v374_v30 = vadd.f32 %v316_v24, %v1196_v4  ;;  %v748_v32 = vsel %vm379_vm2, %v746_v62, %v747_v20  ;;  %v274_v31 = vmul.f32 0.0625, %v246_v22 }
  0x7e   :  { %v414_v23 = vrot.slane %v1227_v37, 1  ;;  %v177_v26 = vadd.f32 %v1202_v57, %v1196_v4  ;;  %v682_v36 = vmul.f32 0.25, %v1225_v33  ;;  %v683_v38 = vmul.f32 0.25, %v1227_v37  ;;  %v1285_v4 = vld [vmem:[#allocation2 + $0xe8] sm:$0xff] }
  0x7f   :  { %v594_v34 = vsel %vm379_vm2, %v592_v35, %v593_v27  ;;  %v653_v55 = vadd.f32 %v593_v27, %v273_v21  ;;  %v214_v49 = vrot.slane %v1280_v39, 2  ;;  %v206_v57 = vadd.f32 %v178_v14, %v1280_v39  ;;  %v53_v14 = vld [vmem:[#allocation2 + $0xf0] sm:$0xff] }
  0x80   :  { %v652_v48 = vadd.f32 %v594_v34, %v272_v19  ;;  %v415_v40 = vsel %vm379_vm2, %v413_v25, %v414_v23  ;;  %v473_v41 = vadd.f32 %v414_v23, %v374_v30  ;;  %v205_v45 = vadd.f32 %v177_v26, %v1253_v1 }
  0x81   :  { %v807_v42 = vadd.f32 %v747_v20, %v653_v55  ;;  %v472_v44 = vadd.f32 %v415_v40, %v373_v28  ;;  %v215_v50 = vrot.slane %v1285_v4, 2  ;;  %v317_v51 = vrot.slane %v1251_v63, 7 }
  0x82   :  { %v806_v46 = vadd.f32 %v748_v32, %v652_v48  ;;  %v501_v47 = vadd.f32 %v473_v41, %v1253_v1  ;;  %v749_v54 = vrot.slane %v682_v36, 1  ;;  %v247_v59 = vadd.f32 %v205_v45, %v1258_v9 }
  0x83   :  { %835 = vst [vmem:[#allocation5 + $0xa8] sm:$0x3f] %v807_v42  ;;  %v500_v56 = vadd.f32 %v472_v44, %v1251_v63  ;;  %v318_v52 = vrot.slane %v1253_v1, 7  ;;  %v750_v58 = vrot.slane %v683_v38, 1  ;;  %v216_v2 = vsel %vm83_vm0, %v214_v49, %v215_v50 }
  0x84   :  { %834 = vst [vmem:[#allocation5 + $0xa0] sm:$0xff] %v806_v46  ;;  %v529_v53 = vmul.f32 0.125, %v501_v47  ;;  %v416_v60 = vrot.slane %v1251_v63, 1  ;;  %v275_v5 = vmul.f32 0.0625, %v247_v59  ;;  %v375_v61 = vadd.f32 %v317_v51, %v1225_v33 }
  0x85   :  { %v528_v0 = vmul.f32 0.125, %v500_v56  ;;  %v319_v10 = vsel %vm280_vm1, %v317_v51, %v318_v52  ;;  %v417_v6 = vrot.slane %v1253_v1, 1  ;;  %v684_v7 = vmul.f32 0.25, %v1251_v63 }
  0x86   :  { %v596_v62 = vrot.slane %v529_v53, 1  ;;  %v376_v13 = vadd.f32 %v319_v10, %v1227_v37  ;;  %v180_v11 = vadd.f32 %v125_v17, %v1251_v63  ;;  %v685_v20 = vmul.f32 0.25, %v1253_v1  ;;  %v54_v17 = vld [vmem:[#allocation2 + $0xf8] sm:$0xff] }
  0x87   :  { %v595_v8 = vrot.slane %v528_v0, 1  ;;  %v179_v15 = vadd.f32 %v1232_v43, %v1227_v37  ;;  %v751_v12 = vsel %vm379_vm2, %v749_v54, %v750_v58  ;;  %v418_v33 = vsel %vm379_vm2, %v416_v60, %v417_v6 }
  0x88   :  { %v655_v16 = vadd.f32 %v596_v62, %v275_v5  ;;  %v475_v3 = vadd.f32 %v417_v6, %v376_v13  ;;  %v248_v18 = vadd.f32 %v216_v2, %v206_v57  ;;  %v474_v22 = vadd.f32 %v418_v33, %v375_v61 }
  0x89   :  { %v597_v29 = vsel %vm379_vm2, %v595_v8, %v596_v62  ;;  %v207_v19 = vadd.f32 %v179_v15, %v1285_v4  ;;  %v752_v35 = vrot.slane %v684_v7, 1  ;;  %v753_v43 = vrot.slane %v685_v20, 1 }
  0x8a   :  { %v654_v21 = vadd.f32 %v597_v29, %v274_v31  ;;  %v809_v24 = vadd.f32 %v750_v58, %v655_v16  ;;  %v503_v25 = vadd.f32 %v475_v3, %v1285_v4  ;;  %v502_v37 = vadd.f32 %v474_v22, %v1280_v39 }
  0x8b   :  { %v249_v27 = vadd.f32 %v215_v50, %v207_v19  ;;  %v217_v28 = vrot.slane %v53_v14, 2  ;;  %v218_v23 = vrot.slane %v54_v17, 2  ;;  %v320_v26 = vrot.slane %v1280_v39, 7 }
  0x8c   :  { %v808_v30 = vadd.f32 %v751_v12, %v654_v21  ;;  %837 = vst [vmem:[#allocation5 + $0xb8] sm:$0x3f] %v809_v24  ;;  %v531_v32 = vmul.f32 0.125, %v503_v25  ;;  %v530_v34 = vmul.f32 0.125, %v502_v37  ;;  %v321_v36 = vrot.slane %v1285_v4, 7 }
  0x8d   :  { %v277_v55 = vmul.f32 0.0625, %v249_v27  ;;  %v419_v31 = vrot.slane %v1280_v39, 1  ;;  %v276_v38 = vmul.f32 0.0625, %v248_v18  ;;  %v377_v40 = vadd.f32 %v320_v26, %v1251_v63 }
  0x8e   :  { %836 = vst [vmem:[#allocation5 + $0xb0] sm:$0xff] %v808_v30  ;;  %v599_v48 = vrot.slane %v531_v32, 1  ;;  %v420_v41 = vrot.slane %v1285_v4, 1  ;;  %v598_v49 = vrot.slane %v530_v34, 1  ;;  %v208_v42 = vadd.f32 %v180_v11, %v53_v14 }
  0x8f   :  { %v322_v44 = vsel %vm280_vm1, %v320_v26, %v321_v36  ;;  %v219_v57 = vsel %vm83_vm0, %v217_v28, %v218_v23  ;;  %v754_v51 = vsel %vm379_vm2, %v752_v35, %v753_v43  ;;  %v686_v63 = vmul.f32 0.25, %v1280_v39 }
  0x90   :  { %v657_v45 = vadd.f32 %v599_v48, %v277_v55  ;;  %v378_v46 = vadd.f32 %v322_v44, %v1253_v1  ;;  %v421_v47 = vsel %vm379_vm2, %v419_v31, %v420_v41  ;;  %v600_v50 = vsel %vm379_vm2, %v598_v49, %v599_v48 }
  0x91   :  { %v476_v56 = vadd.f32 %v421_v47, %v377_v40  ;;  %v656_v54 = vadd.f32 %v600_v50, %v276_v38  ;;  %v687_v53 = vmul.f32 0.25, %v1285_v4  ;;  %v250_v58 = vadd.f32 %v219_v57, %v208_v42 }
  0x92   :  { %v811_v59 = vadd.f32 %v753_v43, %v657_v45  ;;  %v477_v52 = vadd.f32 %v420_v41, %v378_v46  ;;  %v181_v60 = vadd.f32 %v1258_v9, %v1253_v1  ;;  %v755_v13 = vrot.slane %v686_v63, 1 }
  0x93   :  { %v504_v2 = vadd.f32 %v476_v56, %v53_v14  ;;  %v810_v0 = vadd.f32 %v754_v51, %v656_v54  ;;  %v756_v6 = vrot.slane %v687_v53, 1  ;;  %v278_v39 = vmul.f32 0.0625, %v250_v58 }
  0x94   :  { %839 = vst [vmem:[#allocation5 + $0xc8] sm:$0x3f] %v811_v59  ;;  %v505_v5 = vadd.f32 %v477_v52, %v54_v17  ;;  %v209_v61 = vadd.f32 %v181_v60, %v54_v17 }
  0x95   :  { %v532_v10 = vmul.f32 0.125, %v504_v2  ;;  %838 = vst [vmem:[#allocation5 + $0xc0] sm:$0xff] %v810_v0  ;;  %v757_v15 = vsel %vm379_vm2, %v755_v13, %v756_v6 }
  0x96   :  { %v533_v62 = vmul.f32 0.125, %v505_v5  ;;  %v251_v11 = vadd.f32 %v218_v23, %v209_v61 }
  0x97   :  { %v601_v7 = vrot.slane %v532_v10, 1 }
  0x98   :  { %v602_v8 = vrot.slane %v533_v62, 1  ;;  %v279_v20 = vmul.f32 0.0625, %v251_v11 }
  0x9a   :  { %v603_v4 = vsel %vm379_vm2, %v601_v7, %v602_v8  ;;  %v659_v9 = vadd.f32 %v602_v8, %v279_v20 }
  0x9b   :  { %v658_v1 = vadd.f32 %v603_v4, %v278_v39 }
  0x9c   :  { %v813_v16 = vadd.f32 %v756_v6, %v659_v9 }
  0x9d   :  { %v812_v12 = vadd.f32 %v757_v15, %v658_v1 }
  0x9e   :  { %841 = vst [vmem:[#allocation5 + $0xd8] sm:$0x3f] %v813_v16 }
  0x9f   :  { %840 = vst [vmem:[#allocation5 + $0xd0] sm:$0xff] %v812_v12 }
  0xa0   :  { %896 = shalt.err (!%p893_p12)
}
  0xa1   :  { %s897_s24 = scalar_lea.hbm %s1344_s1, 3584 }
  0xa2   :  { %p898_p13 = scmp.ne.s32.totalorder %s1344_s1, %s897_s24  ;;  %p901_p0 = scmp.lt.u32.totalorder %s897_s24, %s1344_s1 }
  0xa4   :  { %p903_p1 = pnand %p901_p0, %p898_p13 }
  0xa6   :  { %906 = shalt.err (!%p903_p1)
}
  0xa7   :  { %853 = dma.vmem_to_hbm [thread:$0]  %s848_s20, 3584, %s1344_s1, [#allocation4], %s912_s16, %s912_s16, %s913_s17  }
  0xa8   :  { %909 = dma.done.wait [#allocation4], 3584  }
  0xa9   :  { %910 = vsyncadd [#allocation4], 4294963712 }
  0xaa   :  { %857 = vsyncpa [#allocation3], 1 }
  0xab   :  { %858 = vsyncpa [#allocation4], 1 }

</bundles_post_ra>
